<compile_context>
chip_gen: v7x
topology: tpu7x:2x2x1
jax: 0.10.0
libtpu: 0.0.40
codegen_flags: <defaults>
</compile_context>

<pallas_src>
import functools

import jax
import jax.numpy as jnp
from jax.experimental import pallas as pl
from jax.experimental.pallas import tpu as pltpu


def _round_up(n, m):
    return ((n + m - 1) // m) * m


def _cdiv(a, b):
    return (a + b - 1) // b


def _mlp_kernel(x_ref, w1_ref, b1_ref, w2_ref, b2_ref, w3_ref, b3_ref,
                w4_ref, b4_ref, o_ref):
    """Fused (Linear->ReLU) x3 -> Linear -> sigmoid on one batch tile.

    x_ref is the natural (tile, F) row-major tile; the first matmul contracts
    the feature axis of both operands so all activations are (features, batch)
    and the final (O, tile) store is lane-dense.  All accumulation is f32.
    """
    x = x_ref[...]                                                    # (bt, F) f32

    # (H, F) x (bt, F) contracting F on both sides -> (H, bt); the MXU absorbs
    # the operand transpose for free.
    h = jax.lax.dot_general(w1_ref[...], x, (((1,), (1,)), ((), ())),
                            preferred_element_type=jnp.float32)       # (H, bt)
    h = jnp.maximum(h + b1_ref[...], 0.0)   # ReLU; Dropout is identity in eval

    h = jnp.dot(w2_ref[...], h, preferred_element_type=jnp.float32)   # (H, bt)
    h = jnp.maximum(h + b2_ref[...], 0.0)

    h = jnp.dot(w3_ref[...], h, preferred_element_type=jnp.float32)   # (H2, bt)
    h = jnp.maximum(h + b3_ref[...], 0.0)

    y = jnp.dot(w4_ref[...], h, preferred_element_type=jnp.float32)   # (O, bt)
    y = y + b4_ref[...]
    o_ref[...] = jax.nn.sigmoid(y).astype(o_ref.dtype)                # lane-dense store


@functools.partial(jax.jit, static_argnames=("batch_tile",))
def trans_net2_forward(x, params, *, batch_tile=8192):
    """Forward pass of transNet2 (eval mode).

    params follow the PyTorch layout: w_l [fan_out, fan_in], b_l [fan_out, 1].
    x is [batch, in_feature_num]; returns [batch] when output==1 (squeeze(-1)).
    """
    w1, b1, w2, b2, w3, b3, w4, b4 = params
    B, F = x.shape
    H = w1.shape[0]
    H2 = w3.shape[0]
    O = w4.shape[0]

    # Batch tile (rows -> sublanes of x, lanes of the activations):
    #  - multiple of 128, at most batch_tile,
    #  - never larger than the padded batch,
    #  - at most ceil(padded_B / 2) so v7x's two TensorCores both get a step.
    padded_min = _round_up(B, 128)
    tile = min(_round_up(batch_tile, 128),
               _round_up(_cdiv(padded_min, 2), 128))
    tile = max(tile, 128)
    padded_B = _round_up(B, tile)
    grid = (padded_B // tile,)

    # x keeps its natural (B, F) f32 layout: no transpose/cast HBM pass.
    # Zero-pad rows only when B is not already a multiple of the tile.
    x_p = x if padded_B == B else jnp.pad(x, ((0, padded_B - B), (0, 0)))

    in_specs = [
        pl.BlockSpec((tile, F), lambda i: (i, 0)),   # x: tiled over batch rows
        pl.BlockSpec((H, F), lambda i: (0, 0)),      # w1 (VMEM-resident)
        pl.BlockSpec((H, 1), lambda i: (0, 0)),      # b1
        pl.BlockSpec((H, H), lambda i: (0, 0)),      # w2
        pl.BlockSpec((H, 1), lambda i: (0, 0)),      # b2
        pl.BlockSpec((H2, H), lambda i: (0, 0)),     # w3
        pl.BlockSpec((H2, 1), lambda i: (0, 0)),     # b3
        pl.BlockSpec((O, H2), lambda i: (0, 0)),     # w4
        pl.BlockSpec((O, 1), lambda i: (0, 0)),      # b4
    ]
    out_specs = pl.BlockSpec((O, tile), lambda i: (0, i))  # lane-dense output tile

    out_t = pl.pallas_call(
        _mlp_kernel,
        out_shape=jax.ShapeDtypeStruct((O, padded_B), jnp.float32),
        grid_spec=pltpu.PrefetchScalarGridSpec(
            num_scalar_prefetch=0,
            grid=grid,
            in_specs=in_specs,
            out_specs=out_specs,
        ),
        compiler_params=pltpu.CompilerParams(
            dimension_semantics=("parallel",)),
    )(x_p, w1, b1, w2, b2, w3, b3, w4, b4)

    out = out_t[:, :B].T          # drop batch padding, back to (B, O) row layout
    if O == 1:                    # torch .squeeze(-1) semantics (only if size 1)
        out = jnp.squeeze(out, axis=-1)
    return out


def init_params(key, in_feature_num, hidden, output):
    """Uniform(+-1/sqrt(fan_in)) like PyTorch nn.Linear defaults.

    Weights in PyTorch layout [fan_out, fan_in]; biases as columns [fan_out, 1].
    """
    dims = [
        (in_feature_num, hidden),
        (hidden, hidden),
        (hidden, hidden // 2),
        (hidden // 2, output),
    ]
    params = []
    for fan_in, fan_out in dims:
        key, kw, kb = jax.random.split(key, 3)
        bound = 1.0 / float(fan_in) ** 0.5
        w = jax.random.uniform(kw, (fan_out, fan_in), jnp.float32, -bound, bound)
        b = jax.random.uniform(kb, (fan_out, 1), jnp.float32, -bound, bound)
        params.extend([w, b])
    return tuple(params)


def reference_forward(x, params):
    """Plain-JAX f32 reference of transNet2.forward (eval mode)."""
    w1, b1, w2, b2, w3, b3, w4, b4 = params
    hp = jax.lax.Precision.HIGHEST
    h = jnp.maximum(jnp.dot(x, w1.T, precision=hp) + b1[:, 0], 0.0)
    h = jnp.maximum(jnp.dot(h, w2.T, precision=hp) + b2[:, 0], 0.0)
    h = jnp.maximum(jnp.dot(h, w3.T, precision=hp) + b3[:, 0], 0.0)
    y = jax.nn.sigmoid(jnp.dot(h, w4.T, precision=hp) + b4[:, 0])
    if y.shape[-1] == 1:
        y = jnp.squeeze(y, axis=-1)
    return y


if __name__ == "__main__":
    in_feature_num, hidden, output = 32, 32, 1

    key = jax.random.PRNGKey(0)
    key, kp = jax.random.split(key)
    params = init_params(kp, in_feature_num, hidden, output)

    # Small batch consistent with the module (padded up to one 128-wide tile).
    key, kx = jax.random.split(key)
    x_small = jax.random.normal(kx, (8, in_feature_num), jnp.float32)
    out_small = jax.block_until_ready(trans_net2_forward(x_small, params))
    ref_small = reference_forward(x_small, params)
    assert out_small.shape == (8,), f"bad output shape {out_small.shape}"
    assert jnp.allclose(out_small, ref_small, atol=5e-3), "small-batch mismatch vs reference"

    # Multi-tile path: grid > 1 with a batch that is not a multiple of the tile.
    key, kx2 = jax.random.split(key)
    x_big = jax.random.normal(kx2, (1000, in_feature_num), jnp.float32)
    out_big = jax.block_until_ready(
        trans_net2_forward(x_big, params, batch_tile=512))
    ref_big = reference_forward(x_big, params)
    assert out_big.shape == (1000,), f"bad output shape {out_big.shape}"
    assert jnp.allclose(out_big, ref_big, atol=5e-3), "large-batch mismatch vs reference"

    print("KERNEL_OK")
</pallas_src>

<mosaic_0001>
module attributes {stable_mosaic.version = 11 : i64} {
  func.func @_mlp_kernel(%arg0: i32, %arg1: memref<128x32xf32, #tpu.memory_space<vmem>>, %arg2: memref<32x32xf32, #tpu.memory_space<vmem>>, %arg3: memref<32x1xf32, #tpu.memory_space<vmem>>, %arg4: memref<32x32xf32, #tpu.memory_space<vmem>>, %arg5: memref<32x1xf32, #tpu.memory_space<vmem>>, %arg6: memref<16x32xf32, #tpu.memory_space<vmem>>, %arg7: memref<16x1xf32, #tpu.memory_space<vmem>>, %arg8: memref<1x16xf32, #tpu.memory_space<vmem>>, %arg9: memref<1x1xf32, #tpu.memory_space<vmem>>, %arg10: memref<1x128xf32, #tpu.memory_space<vmem>>) attributes {dimension_semantics = [#tpu.dimension_semantics<parallel>], iteration_bounds = array<i64: 1>, scalar_prefetch = 0 : i64, scratch_operands = 0 : i64, tpu.core_type = #tpu.core_type<tc>, window_params = [{transform_indices = @transform_0, window_bounds = array<i64: 128, 32>}, {pipeline_mode = #tpu.pipeline_mode<synchronous>, transform_indices = @transform_1, window_bounds = array<i64: 32, 32>}, {pipeline_mode = #tpu.pipeline_mode<synchronous>, transform_indices = @transform_2, window_bounds = array<i64: 32, 1>}, {pipeline_mode = #tpu.pipeline_mode<synchronous>, transform_indices = @transform_3, window_bounds = array<i64: 32, 32>}, {pipeline_mode = #tpu.pipeline_mode<synchronous>, transform_indices = @transform_4, window_bounds = array<i64: 32, 1>}, {pipeline_mode = #tpu.pipeline_mode<synchronous>, transform_indices = @transform_5, window_bounds = array<i64: 16, 32>}, {pipeline_mode = #tpu.pipeline_mode<synchronous>, transform_indices = @transform_6, window_bounds = array<i64: 16, 1>}, {pipeline_mode = #tpu.pipeline_mode<synchronous>, transform_indices = @transform_7, window_bounds = array<i64: 1, 16>}, {pipeline_mode = #tpu.pipeline_mode<synchronous>, transform_indices = @transform_8, window_bounds = array<i64: 1, 1>}, {transform_indices = @transform_9, window_bounds = array<i64: 1, 128>}]} {
    %c0 = arith.constant 0 : index
    %c0_0 = arith.constant 0 : index
    %0 = vector.load %arg1[%c0, %c0_0] : memref<128x32xf32, #tpu.memory_space<vmem>>, vector<128x32xf32>
    %c0_1 = arith.constant 0 : index
    %c0_2 = arith.constant 0 : index
    %1 = vector.load %arg2[%c0_1, %c0_2] : memref<32x32xf32, #tpu.memory_space<vmem>>, vector<32x32xf32>
    %cst = arith.constant dense<0.000000e+00> : vector<32x128xf32>
    %2 = tpu.matmul %1, %0, %cst {dimension_numbers = #tpu.dot_dimension_numbers<[1], [1], [0], [0], [0, 0, 1, 0], [], []>} : vector<32x32xf32>, vector<128x32xf32>, vector<32x128xf32> -> vector<32x128xf32>
    %c0_3 = arith.constant 0 : index
    %c0_4 = arith.constant 0 : index
    %3 = vector.load %arg3[%c0_3, %c0_4] : memref<32x1xf32, #tpu.memory_space<vmem>>, vector<32x1xf32>
    %4 = vector.broadcast %3 : vector<32x1xf32> to vector<32x128xf32>
    %5 = arith.addf %2, %4 : vector<32x128xf32>
    %cst_5 = arith.constant 0.000000e+00 : f32
    %6 = vector.broadcast %cst_5 : f32 to vector<32x128xf32>
    %7 = arith.maximumf %5, %6 : vector<32x128xf32>
    %c0_6 = arith.constant 0 : index
    %c0_7 = arith.constant 0 : index
    %8 = vector.load %arg4[%c0_6, %c0_7] : memref<32x32xf32, #tpu.memory_space<vmem>>, vector<32x32xf32>
    %cst_8 = arith.constant dense<0.000000e+00> : vector<32x128xf32>
    %9 = tpu.matmul %8, %7, %cst_8 {dimension_numbers = #tpu.dot_dimension_numbers<[1], [0], [0], [1], [0, 0, 1, 1], [], []>} : vector<32x32xf32>, vector<32x128xf32>, vector<32x128xf32> -> vector<32x128xf32>
    %c0_9 = arith.constant 0 : index
    %c0_10 = arith.constant 0 : index
    %10 = vector.load %arg5[%c0_9, %c0_10] : memref<32x1xf32, #tpu.memory_space<vmem>>, vector<32x1xf32>
    %11 = vector.broadcast %10 : vector<32x1xf32> to vector<32x128xf32>
    %12 = arith.addf %9, %11 : vector<32x128xf32>
    %cst_11 = arith.constant 0.000000e+00 : f32
    %13 = vector.broadcast %cst_11 : f32 to vector<32x128xf32>
    %14 = arith.maximumf %12, %13 : vector<32x128xf32>
    %c0_12 = arith.constant 0 : index
    %c0_13 = arith.constant 0 : index
    %15 = vector.load %arg6[%c0_12, %c0_13] : memref<16x32xf32, #tpu.memory_space<vmem>>, vector<16x32xf32>
    %cst_14 = arith.constant dense<0.000000e+00> : vector<16x128xf32>
    %16 = tpu.matmul %15, %14, %cst_14 {dimension_numbers = #tpu.dot_dimension_numbers<[1], [0], [0], [1], [0, 0, 1, 1], [], []>} : vector<16x32xf32>, vector<32x128xf32>, vector<16x128xf32> -> vector<16x128xf32>
    %c0_15 = arith.constant 0 : index
    %c0_16 = arith.constant 0 : index
    %17 = vector.load %arg7[%c0_15, %c0_16] : memref<16x1xf32, #tpu.memory_space<vmem>>, vector<16x1xf32>
    %18 = vector.broadcast %17 : vector<16x1xf32> to vector<16x128xf32>
    %19 = arith.addf %16, %18 : vector<16x128xf32>
    %cst_17 = arith.constant 0.000000e+00 : f32
    %20 = vector.broadcast %cst_17 : f32 to vector<16x128xf32>
    %21 = arith.maximumf %19, %20 : vector<16x128xf32>
    %c0_18 = arith.constant 0 : index
    %c0_19 = arith.constant 0 : index
    %22 = vector.load %arg8[%c0_18, %c0_19] : memref<1x16xf32, #tpu.memory_space<vmem>>, vector<1x16xf32>
    %cst_20 = arith.constant dense<0.000000e+00> : vector<1x128xf32>
    %23 = tpu.matmul %22, %21, %cst_20 {dimension_numbers = #tpu.dot_dimension_numbers<[1], [0], [0], [1], [0, 0, 1, 1], [], []>} : vector<1x16xf32>, vector<16x128xf32>, vector<1x128xf32> -> vector<1x128xf32>
    %c0_21 = arith.constant 0 : index
    %c0_22 = arith.constant 0 : index
    %24 = vector.load %arg9[%c0_21, %c0_22] : memref<1x1xf32, #tpu.memory_space<vmem>>, vector<1x1xf32>
    %25 = vector.broadcast %24 : vector<1x1xf32> to vector<1x128xf32>
    %26 = arith.addf %23, %25 : vector<1x128xf32>
    %27 = arith.negf %26 : vector<1x128xf32>
    %28 = math.exp %27 : vector<1x128xf32>
    %cst_23 = arith.constant 1.000000e+00 : f32
    %29 = vector.broadcast %cst_23 : f32 to vector<1x128xf32>
    %30 = arith.addf %29, %28 : vector<1x128xf32>
    %31 = arith.divf %29, %30 : vector<1x128xf32>
    %c0_24 = arith.constant 0 : index
    %c0_25 = arith.constant 0 : index
    %32 = vector.load %arg10[%c0_24, %c0_25] : memref<1x128xf32, #tpu.memory_space<vmem>>, vector<1x128xf32>
    tpu.vector_store %arg10[%c0_24, %c0_25], %31 {strides = array<i32>} : memref<1x128xf32, #tpu.memory_space<vmem>>, vector<1x128xf32>,
    return
  }
  func.func @transform_0(%arg0: i32) -> (i32, i32) {
    %c0_i32 = arith.constant 0 : i32
    %c0_i32_0 = arith.constant 0 : i32
    return %arg0, %c0_i32 : i32, i32
  }
  func.func @transform_1(%arg0: i32) -> (i32, i32) {
    %c0_i32 = arith.constant 0 : i32
    %c0_i32_0 = arith.constant 0 : i32
    %c0_i32_1 = arith.constant 0 : i32
    return %c0_i32, %c0_i32_0 : i32, i32
  }
  func.func @transform_2(%arg0: i32) -> (i32, i32) {
    %c0_i32 = arith.constant 0 : i32
    %c0_i32_0 = arith.constant 0 : i32
    %c0_i32_1 = arith.constant 0 : i32
    return %c0_i32, %c0_i32_0 : i32, i32
  }
  func.func @transform_3(%arg0: i32) -> (i32, i32) {
    %c0_i32 = arith.constant 0 : i32
    %c0_i32_0 = arith.constant 0 : i32
    %c0_i32_1 = arith.constant 0 : i32
    return %c0_i32, %c0_i32_0 : i32, i32
  }
  func.func @transform_4(%arg0: i32) -> (i32, i32) {
    %c0_i32 = arith.constant 0 : i32
    %c0_i32_0 = arith.constant 0 : i32
    %c0_i32_1 = arith.constant 0 : i32
    return %c0_i32, %c0_i32_0 : i32, i32
  }
  func.func @transform_5(%arg0: i32) -> (i32, i32) {
    %c0_i32 = arith.constant 0 : i32
    %c0_i32_0 = arith.constant 0 : i32
    %c0_i32_1 = arith.constant 0 : i32
    return %c0_i32, %c0_i32_0 : i32, i32
  }
  func.func @transform_6(%arg0: i32) -> (i32, i32) {
    %c0_i32 = arith.constant 0 : i32
    %c0_i32_0 = arith.constant 0 : i32
    %c0_i32_1 = arith.constant 0 : i32
    return %c0_i32, %c0_i32_0 : i32, i32
  }
  func.func @transform_7(%arg0: i32) -> (i32, i32) {
    %c0_i32 = arith.constant 0 : i32
    %c0_i32_0 = arith.constant 0 : i32
    %c0_i32_1 = arith.constant 0 : i32
    return %c0_i32, %c0_i32_0 : i32, i32
  }
  func.func @transform_8(%arg0: i32) -> (i32, i32) {
    %c0_i32 = arith.constant 0 : i32
    %c0_i32_0 = arith.constant 0 : i32
    %c0_i32_1 = arith.constant 0 : i32
    return %c0_i32, %c0_i32_0 : i32, i32
  }
  func.func @transform_9(%arg0: i32) -> (i32, i32) {
    %c0_i32 = arith.constant 0 : i32
    %c0_i32_0 = arith.constant 0 : i32
    return %c0_i32, %arg0 : i32, i32
  }
}

</mosaic_0001>

<bundles_post_ra>
// kernel: trans_net2_forward.1
= control target key start
LH: loop header
LB: loop body
LE: loop exit
PB: predicated region body
PF: predicated region fallthrough
CT: control target
= control target key end

     0   :  { %vm78_vm0 = vcmask 261120   ;;  %v762_v3 = vmov 0   ;;  %vm764_vm2 = vmmov 0   ;;  %vm465_vm3 = vcmask 130048   ;;  %s981_s0 = inlined_call_operand.vmem [shape: f32[128,32], index: 0, kind: input, shape index: {}]   ;;  %s982_s8 = inlined_call_operand.<no memory space> [shape: f32[1,1], index: 8, kind: input, shape index: {}]   ;;  %s983_s1 = inlined_call_operand.vmem [shape: f32[32,32], index: 1, kind: input, shape index: {}]   ;;  %s984_s2 = inlined_call_operand.vmem [shape: f32[32,1], index: 2, kind: input, shape index: {}]   ;;  %s985_s4 = inlined_call_operand.vmem [shape: f32[32,1], index: 4, kind: input, shape index: {}]   ;;  %s986_s6 = inlined_call_operand.vmem [shape: f32[16,1], index: 6, kind: input, shape index: {}]   ;;  %s987_s3 = inlined_call_operand.vmem [shape: f32[32,32], index: 3, kind: input, shape index: {}]   ;;  %s988_s5 = inlined_call_operand.vmem [shape: f32[16,32], index: 5, kind: input, shape index: {}]   ;;  %s989_s7 = inlined_call_operand.vmem [shape: f32[1,16], index: 7, kind: input, shape index: {}]   ;;  %s990_s9 = inlined_call_operand.vmem [shape: f32[1,128], index: 9, kind: output, shape index: {}]  }
   0x1   :  { %v34_v0 = vld [vmem:[%s981_s0] sm:$0xff]  ;;  %v35_v1 = vld [vmem:[%s981_s0 + $0x8] sm:$0xff]  ;;  %vm824_vm1 = vmpackc.low %vm78_vm0, %vm78_vm0  ;;  %756 = vset.pattern.permute.xlu0 %v762_v3  ;;  %757 = vset.pattern.permute.xlu1 %v762_v3  ;;  %v14_v4 = vstv %s982_s8 }
   0x2   :  { %v685_v5 = vpack.c.bf16 %v35_v1, %v34_v0  ;;  %v36_v6 = vld [vmem:[%s981_s0 + $0x10] sm:$0xff]  ;;  %v37_v7 = vld [vmem:[%s981_s0 + $0x18] sm:$0xff]  ;;  %15 = vst [vmem:[#allocation2] sm:$0x1] %v14_v4  ;;  %v50_v9 = vld [vmem:[%s983_s1] sm:$0xff] }
   0x3   :  { %v691_v8 = vpack.c.bf16 %v37_v7, %v36_v6  ;;  %v38_v10 = vld [vmem:[%s981_s0 + $0x20] sm:$0xff]  ;;  %v39_v11 = vld [vmem:[%s981_s0 + $0x28] sm:$0xff]  ;;  %647 = vmatprep.mubr.msk.f32.mxu0 %vm78_vm0, %v50_v9  ;;  %v56_v13 = vld [vmem:[%s984_s2 + $0x10] sm:$0xff] }
   0x4   :  { %687 = vmatprep.subr.msk.bf16.mxu0 %vm824_vm1, %v685_v5  ;;  %v54_v12 = vld [vmem:[%s984_s2] sm:$0xff]  ;;  %70 = vperm.xlu1 %757, %v56_v13   ;;  %v697_v14 = vpack.c.bf16 %v39_v11, %v38_v10  ;;  %v55_v15 = vld [vmem:[%s984_s2 + $0x8] sm:$0xff]  ;;  %v57_v16 = vld [vmem:[%s984_s2 + $0x18] sm:$0xff] }
   0x5   :  { %690 = vmatpush3.bf16.xpose.msk.msra.mxu0 %vm824_vm1, %v685_v5  ;;  %60 = vperm.xlu0 %756, %v54_v12   ;;  %v232_v17 = vld [vmem:[%s985_s4] sm:$0xff]  ;;  %v40_v18 = vld [vmem:[%s981_s0 + $0x30] sm:$0xff]  ;;  %v41_v19 = vld [vmem:[%s981_s0 + $0x38] sm:$0xff] }
   0x6   :  { %693 = vmatprep.subr.msk.bf16.mxu0 %vm824_vm1, %v691_v8  ;;  %v233_v20 = vld [vmem:[%s985_s4 + $0x8] sm:$0xff]  ;;  %v703_v21 = vpack.c.bf16 %v41_v19, %v40_v18  ;;  %v234_v22 = vld [vmem:[%s985_s4 + $0x10] sm:$0xff]  ;;  %v235_v23 = vld [vmem:[%s985_s4 + $0x18] sm:$0xff] }
   0x7   :  { %v359_v24 = vld [vmem:[%s986_s6] sm:$0xff]  ;;  %v43_v26 = vld [vmem:[%s981_s0 + $0x48] sm:$0xff]  ;;  %v44_v30 = vld [vmem:[%s981_s0 + $0x50] sm:$0xff] }
   0x8   :  { %75 = vperm.xlu1 %757, %v57_v16   ;;  %v42_v25 = vld [vmem:[%s981_s0 + $0x40] sm:$0xff]  ;;  %v360_v27 = vld [vmem:[%s986_s6 + $0x8] sm:$0xff]  ;;  %v45_v31 = vld [vmem:[%s981_s0 + $0x58] sm:$0xff] }
   0x9   :  { %65 = vperm.xlu0 %756, %v55_v15   ;;  %v709_v28 = vpack.c.bf16 %v43_v26, %v42_v25  ;;  %v455_v29 = vld [vmem:[#allocation2] sm:$0x1]  ;;  %v715_v32 = vpack.c.bf16 %v45_v31, %v44_v30  ;;  %v47_v34 = vld [vmem:[%s981_s0 + $0x68] sm:$0xff]  ;;  %v48_v36 = vld [vmem:[%s981_s0 + $0x70] sm:$0xff] }
   0xa   :  { %v46_v33 = vld [vmem:[%s981_s0 + $0x60] sm:$0xff]  ;;  %v49_v37 = vld [vmem:[%s981_s0 + $0x78] sm:$0xff]  ;;  %v51_v39 = vld [vmem:[%s983_s1 + $0x8] sm:$0xff] }
   0xb   :  { %v721_v35 = vpack.c.bf16 %v47_v34, %v46_v33  ;;  %v727_v38 = vpack.c.bf16 %v49_v37, %v48_v36  ;;  %v52_v40 = vld [vmem:[%s983_s1 + $0x10] sm:$0xff]  ;;  %v53_v41 = vld [vmem:[%s983_s1 + $0x18] sm:$0xff]  ;;  %v228_v42 = vld [vmem:[%s987_s3] sm:$0xff] }
   0xc   :  { %243 = vperm.xlu1 %757, %v233_v20   ;;  %661 = vmatprep.mubr.msk.f32.mxu1 %vm78_vm0, %v228_v42  ;;  %v229_v61 = vld [vmem:[%s987_s3 + $0x8] sm:$0xff]  ;;  %v230_v62 = vld [vmem:[%s987_s3 + $0x10] sm:$0xff]  ;;  %v231_v63 = vld [vmem:[%s987_s3 + $0x18] sm:$0xff]  ;;  %v763_v20 = vmov 0.0|0.0  }
   0xd   :  { %696 = vmatpush3.bf16.xpose.msk.msra.mxu0 %vm824_vm1, %v691_v8  ;;  %238 = vperm.xlu0 %756, %v232_v17   ;;  %v357_v0 = vld [vmem:[%s988_s5] sm:$0xff]  ;;  %v358_v19 = vld [vmem:[%s988_s5 + $0x8] sm:$0xff] }
   0xe   :  { %699 = vmatprep.subr.msk.bf16.mxu0 %vm824_vm1, %v697_v14  ;;  %v454_v31 = vld [vmem:[%s989_s7] sm:$0x1] }
  0x10   :  { %253 = vperm.xlu1 %757, %v235_v23  }
  0x11   :  { %248 = vperm.xlu0 %756, %v234_v22  }
  0x14   :  { %368 = vperm.xlu1 %757, %v360_v27  }
  0x15   :  { %702 = vmatpush3.bf16.xpose.msk.msra.mxu0 %vm824_vm1, %v697_v14  ;;  %363 = vperm.xlu0 %756, %v359_v24  }
  0x16   :  { %705 = vmatprep.subr.msk.bf16.mxu0 %vm824_vm1, %v703_v21 }
  0x19   :  { %458 = vperm.xlu0 %756, %v455_v29  }
  0x1d   :  { %708 = vmatpush3.bf16.xpose.msk.msra.mxu0 %vm824_vm1, %v703_v21  ;;  %v765_v21 = vmov 0.0  }
  0x1e   :  { %711 = vmatprep.subr.msk.bf16.mxu0 %vm824_vm1, %v709_v28 }
  0x25   :  { %714 = vmatpush3.bf16.xpose.msk.msra.mxu0 %vm824_vm1, %v709_v28 }
  0x26   :  { %717 = vmatprep.subr.msk.bf16.mxu0 %vm824_vm1, %v715_v32 }
  0x2d   :  { %720 = vmatpush3.bf16.xpose.msk.msra.mxu0 %vm824_vm1, %v715_v32  ;;  %v461_v32 = vlaneseq }
  0x2e   :  { %723 = vmatprep.subr.msk.bf16.mxu0 %vm824_vm1, %v721_v35 }
  0x2f   :  { %v462_v33 = vshrl.u32 %v461_v32, 7 }
  0x31   :  { %v463_v34 = vsub.s32 0, %v462_v33 }
  0x35   :  { %726 = vmatpush3.bf16.xpose.msk.msra.mxu0 %vm824_vm1, %v721_v35 }
  0x36   :  { %729 = vmatprep.subr.msk.bf16.mxu0 %vm824_vm1, %v727_v38 }
  0x3d   :  { %732 = vmatpush3.bf16.xpose.msk.msra.mxu0 %vm824_vm1, %v727_v38 }
  0x44   :  { %648 = vmatmul.mubr.msk.f32.vlgmr.msra.gmra.mrb[0].mxu0 %vm78_vm0, %v51_v39 }
  0x45   :  { %650 = vmatprep.mubr.msk.f32.mxu0 %vm78_vm0, %v52_v40 }
  0x48   :  { %651 = vmatmul.mubr.msk.f32.gmra.mrb[2].mxu0 %vm78_vm0, %v53_v41 }
  0x83   :  { %v71_v44 = vpop.permute.xlu1 %70 }
  0x84   :  { %v61_v43 = vpop.permute.xlu0 %60 }
  0x87   :  { %v76_v51 = vpop.permute.xlu1 %75 }
  0x88   :  { %v66_v45 = vpop.permute.xlu0 %65 }
  0x8b   :  { %v244_v1 = vpop.permute.xlu1 %243 }
  0x8c   :  { %v239_v2 = vpop.permute.xlu0 %238 }
  0x8f   :  { %v254_v8 = vpop.permute.xlu1 %253 }
  0x90   :  { %v249_v11 = vpop.permute.xlu0 %248 }
  0x93   :  { %v369_v22 = vpop.permute.xlu1 %368 }
  0x94   :  { %v364_v24 = vpop.permute.xlu0 %363 }
  0x98   :  { %v459_v35 = vpop.permute.xlu0 %458 }
  0x99   :  { %v464_v36 = vrot.slane %v459_v35, %v463_v34 }
 0x117   :  { %v649_v46 = vpop.f32.mrb[0].mxu0 }
 0x118   :  { %v211_v47 = vadd.f32 %v649_v46, %v66_v45  ;;  %v205_v48 = vpop.f32.mrb[1].mxu0 }
 0x119   :  { %v206_v49 = vadd.f32 %v205_v48, %v61_v43 }
 0x11a   :  { %v225_v50 = vmax.f32 %v211_v47, 0.0 }
 0x11b   :  { %v224_v52 = vmax.f32 %v206_v49, 0.0  ;;  %v652_v53 = vpop.f32.mrb[2].mxu0 }
 0x11c   :  { %v221_v54 = vadd.f32 %v652_v53, %v76_v51  ;;  %v215_v55 = vpop.f32.mrb[3].mxu0 }
 0x11d   :  { %v216_v56 = vadd.f32 %v215_v55, %v71_v44  ;;  %v733_v57 = vpack.c.bf16 %v225_v50, %v224_v52 }
 0x11e   :  { %v227_v58 = vmax.f32 %v221_v54, 0.0 }
 0x11f   :  { %v226_v59 = vmax.f32 %v216_v56, 0.0  ;;  %734 = vmatprep.subr.bf16.mxu1 %v733_v57 }
 0x120   :  { %736 = vmatpush3.bf16.msra.mxu1 %v733_v57 }
 0x121   :  { %v737_v60 = vpack.c.bf16 %v227_v58, %v226_v59 }
 0x123   :  { %738 = vmatprep.subr.bf16.mxu1 %v737_v60 }
 0x124   :  { %740 = vmatpush3.bf16.msra.mxu1 %v737_v60 }
 0x127   :  { %662 = vmatmul.mubr.msk.f32.vlgmr.msra.gmra.mrb[0].mxu1 %vm78_vm0, %v229_v61 }
 0x128   :  { %664 = vmatprep.mubr.msk.f32.mxu1 %vm78_vm0, %v230_v62 }
 0x12b   :  { %665 = vmatmul.mubr.msk.f32.gmra.mrb[2].mxu1 %vm78_vm0, %v231_v63 }
 0x12c   :  { %675 = vmatprep.mubr.msk.f32.mxu1 %vm78_vm0, %v357_v0 }
 0x1fa   :  { %v663_v3 = vpop.f32.mrb[0].mxu1 }
 0x1fb   :  { %v340_v4 = vadd.f32 %v663_v3, %v244_v1  ;;  %v334_v5 = vpop.f32.mrb[1].mxu1 }
 0x1fc   :  { %v335_v6 = vadd.f32 %v334_v5, %v239_v2 }
 0x1fd   :  { %v354_v7 = vmax.f32 %v340_v4, 0.0 }
 0x1fe   :  { %v353_v9 = vmax.f32 %v335_v6, 0.0  ;;  %v666_v10 = vpop.f32.mrb[2].mxu1 }
 0x1ff   :  { %v350_v12 = vadd.f32 %v666_v10, %v254_v8  ;;  %v344_v13 = vpop.f32.mrb[3].mxu1 }
 0x200   :  { %v741_v14 = vpack.c.bf16 %v354_v7, %v353_v9  ;;  %v345_v15 = vadd.f32 %v344_v13, %v249_v11 }
 0x201   :  { %v356_v16 = vmax.f32 %v350_v12, 0.0 }
 0x202   :  { %v355_v17 = vmax.f32 %v345_v15, 0.0  ;;  %742 = vmatprep.subr.bf16.mxu1 %v741_v14 }
 0x203   :  { %744 = vmatpush3.bf16.msra.mxu1 %v741_v14 }
 0x204   :  { %v745_v18 = vpack.c.bf16 %v356_v16, %v355_v17 }
 0x206   :  { %746 = vmatprep.subr.bf16.mxu1 %v745_v18 }
 0x207   :  { %748 = vmatpush3.bf16.msra.mxu1 %v745_v18 }
 0x208   :  { %749 = vmatprep.subr.bf16.mxu1 %v763_v20 }
 0x20a   :  { %676 = vmatmul.mubr.msk.f32.vlgmr.msra.gmra.mrb[4].mxu1 %vm78_vm0, %v358_v19 }
 0x20b   :  { %682 = vmatprep.mubr.msk.f32.mxu1 %vm764_vm2, %v765_v21 }
 0x2dd   :  { %v677_v23 = vpop.f32.mrb[4].mxu1 }
 0x2de   :  { %v449_v25 = vadd.f32 %v677_v23, %v369_v22  ;;  %v443_v26 = vpop.f32.mrb[5].mxu1 }
 0x2df   :  { %v444_v27 = vadd.f32 %v443_v26, %v364_v24 }
 0x2e0   :  { %v453_v28 = vmax.f32 %v449_v25, 0.0 }
 0x2e1   :  { %v452_v29 = vmax.f32 %v444_v27, 0.0 }
 0x2e3   :  { %v750_v30 = vpack.c.bf16 %v453_v28, %v452_v29 }
 0x2e5   :  { %751 = vmatpush3.bf16.msra.mxu1 %v750_v30 }
 0x2e8   :  { %683 = vmatmul.mubr.msk.f32.vlgmr.msra.gmra.mrb[6].mxu1 %vm465_vm3, %v454_v31 }
 0x3bb   :  { %v535_v37 = vpop.f32.mrb[6].mxu1 }
 0x3bc   :  { %v536_v38 = vadd.f32 %v535_v37, %v464_v36  ;;  %v684_v39 = vpop.f32.mrb[7].mxu1 }
 0x3be   :  { %v577_v40 = vmul.f32 -1.442695, %v536_v38 }
 0x3c0   :  { %758 = vpow2.f32 %v577_v40 }
 0x3ca   :  { %v759_v41 = vpop.eup %758 }
 0x3cb   :  { %v542_v42 = vadd.f32 1.0, %v759_v41 }
 0x3cd   :  { %760 = vrcp.f32 %v542_v42 }
 0x3d7   :  { %v761_v43 = vpop.eup %760 }
 0x3d8   :  { %545 = vst [vmem:[%s990_s9] sm:$0x1] %v761_v43 }

</bundles_post_ra>
